<compile_context>
chip_gen: v6e
topology: v6e:2x2x1
jax: 0.10.0
libtpu: 0.0.40
codegen_flags: <defaults>
</compile_context>

<pallas_src>
from functools import partial

import jax
import jax.numpy as jnp
from jax.experimental import pallas as pl
from jax.experimental.pallas import tpu as pltpu

LANE = 128     # vreg lane width
SUBLANE = 8    # f32 sublanes per vreg


def linear_kernel(x_ref, w_ref, b_ref, o_ref):
    # x_ref: (IN_F, TILE_ROWS, 128) f32 in VMEM   (batch packed into full vregs)
    # w_ref: (IN_F,) f32 in SMEM, b_ref: (1,) f32 in SMEM
    # o_ref: (TILE_ROWS, 128) f32 in VMEM          (lane+sublane-dense output)
    in_f = x_ref.shape[0]
    acc = x_ref[0] * w_ref[0]
    for f in range(1, in_f):              # static unroll, in_f == 3
        acc = acc + x_ref[f] * w_ref[f]
    o_ref[...] = (acc + b_ref[0]).astype(o_ref.dtype)


@partial(jax.jit, static_argnames=("tile_rows",))
def multivariate_linear_regression(x, weight, bias, *, tile_rows=4096):
    """y = x @ weight.T + bias, matching torch.nn.Linear(3, 1).

    x:      (N, 3) float32
    weight: (1, 3) float32   (PyTorch layout: out_features x in_features)
    bias:   (1,)   float32
    returns (N, 1) float32
    """
    n, in_f = x.shape
    out_f = weight.shape[0]
    assert out_f == 1, "module is nn.Linear(3, 1)"

    # --- choose tiling over packed rows of 128 samples -----------------------
    rows = pl.cdiv(n, LANE)                              # 128-sample rows needed
    rows_aligned = pl.cdiv(rows, SUBLANE) * SUBLANE      # multiple of 8 sublanes
    tile_rows = max((int(tile_rows) // SUBLANE) * SUBLANE, SUBLANE)
    tile_rows = min(tile_rows, rows_aligned)
    rows_pad = pl.cdiv(rows_aligned, tile_rows) * tile_rows
    n_pad = rows_pad * LANE

    # --- single fused re-layout pass under jit: pad + transpose + pack -------
    x_pad = jnp.pad(x, ((0, n_pad - n), (0, 0)))         # (n_pad, in_f)
    x_packed = x_pad.T.reshape(in_f, rows_pad, LANE)     # (in_f, rows, 128)

    w_flat = weight.reshape(in_f).astype(jnp.float32)    # (3,) -> SMEM scalars
    b_flat = bias.reshape(out_f).astype(jnp.float32)     # (1,) -> SMEM scalar

    grid = (rows_pad // tile_rows,)

    y_pad = pl.pallas_call(
        linear_kernel,
        out_shape=jax.ShapeDtypeStruct((rows_pad, LANE), x.dtype),
        grid_spec=pltpu.PrefetchScalarGridSpec(
            num_scalar_prefetch=0,
            grid=grid,
            in_specs=[
                # streaming, double-buffered x tiles: full (8,128)-aligned vregs
                pl.BlockSpec((in_f, tile_rows, LANE), lambda i: (0, i, 0)),
                # weight / bias as SMEM scalars (no per-step VMEM DMA)
                pl.BlockSpec(memory_space=pltpu.MemorySpace.SMEM),
                pl.BlockSpec(memory_space=pltpu.MemorySpace.SMEM),
            ],
            out_specs=pl.BlockSpec((tile_rows, LANE), lambda i: (i, 0)),
        ),
        compiler_params=pltpu.CompilerParams(
            # batch tiles are independent -> let megacore (v7x) split them
            dimension_semantics=("parallel",),
            # sized for v7x's 64 MiB physical VMEM (plenty on v5e/v6e 128 MiB)
            vmem_limit_bytes=48 * 1024 * 1024,
        ),
        cost_estimate=pl.CostEstimate(
            flops=2 * in_f * n_pad,
            transcendentals=0,
            bytes_accessed=4 * (in_f + out_f) * n_pad,
        ),
    )(x_packed, w_flat, b_flat)

    # Back to PyTorch's (N, 1) layout; drop padded samples.
    return y_pad.reshape(n_pad)[:n].reshape(n, out_f)


if __name__ == "__main__":
    key = jax.random.PRNGKey(0)
    kx, kw, kb = jax.random.split(key, 3)

    # Small batch of multivariate samples, 3 features each (nn.Linear(3, 1)).
    # N deliberately not a multiple of 128 to exercise padding; tile_rows=16
    # gives a multi-step (3-tile), double-buffered grid at demo scale.
    N, IN_F, OUT_F = 5000, 3, 1
    x = jax.random.normal(kx, (N, IN_F), dtype=jnp.float32)

    # Deterministic parameter init mimicking nn.Linear's U(-1/sqrt(in), 1/sqrt(in)).
    bound = 1.0 / jnp.sqrt(jnp.float32(IN_F))
    weight = jax.random.uniform(kw, (OUT_F, IN_F), jnp.float32, -bound, bound)
    bias = jax.random.uniform(kb, (OUT_F,), jnp.float32, -bound, bound)

    y = multivariate_linear_regression(x, weight, bias, tile_rows=16)
    jax.block_until_ready(y)

    # Correctness check against plain-JAX reference.
    y_ref = x @ weight.T + bias
    assert y.shape == (N, OUT_F)
    assert jnp.allclose(y, y_ref, atol=1e-5, rtol=1e-5)

    # NOTE: for tiny deployed batches (N ~ 8) plain `x @ weight.T + bias` via XLA
    # beats any Pallas kernel due to fixed launch overhead; this kernel targets
    # large-batch inference (default tile_rows=4096 == 512K samples/step).

    print("KERNEL_OK")
</pallas_src>

<mosaic_0001>
module attributes {stable_mosaic.version = 11 : i64} {
  func.func @linear_kernel(%arg0: i32, %arg1: memref<3x16x128xf32, #tpu.memory_space<vmem>>, %arg2: memref<3xf32, #tpu.memory_space<smem>>, %arg3: memref<1xf32, #tpu.memory_space<smem>>, %arg4: memref<16x128xf32, #tpu.memory_space<vmem>>) attributes {dimension_semantics = [#tpu.dimension_semantics<parallel>], iteration_bounds = array<i64: 3>, scalar_prefetch = 0 : i64, scratch_operands = 0 : i64, tpu.core_type = #tpu.core_type<tc>, window_params = [{transform_indices = @transform_0, window_bounds = array<i64: 3, 16, 128>}, {transform_indices = @transform_1, window_bounds = array<i64: 3>}, {transform_indices = @transform_2, window_bounds = array<i64: 1>}, {transform_indices = @transform_3, window_bounds = array<i64: 16, 128>}]} {
    %c0 = arith.constant 0 : index
    %c0_0 = arith.constant 0 : index
    %c0_1 = arith.constant 0 : index
    %0 = vector.load %arg1[%c0, %c0_0, %c0_1] : memref<3x16x128xf32, #tpu.memory_space<vmem>>, vector<1x16x128xf32>
    %1 = vector.shape_cast %0 : vector<1x16x128xf32> to vector<16x128xf32>
    %c0_2 = arith.constant 0 : index
    %2 = memref.load %arg2[%c0_2] : memref<3xf32, #tpu.memory_space<smem>>
    %3 = vector.broadcast %2 : f32 to vector<16x128xf32>
    %4 = arith.mulf %1, %3 : vector<16x128xf32>
    %c1 = arith.constant 1 : index
    %c0_3 = arith.constant 0 : index
    %c0_4 = arith.constant 0 : index
    %5 = vector.load %arg1[%c1, %c0_3, %c0_4] : memref<3x16x128xf32, #tpu.memory_space<vmem>>, vector<1x16x128xf32>
    %6 = vector.shape_cast %5 : vector<1x16x128xf32> to vector<16x128xf32>
    %c1_5 = arith.constant 1 : index
    %7 = memref.load %arg2[%c1_5] : memref<3xf32, #tpu.memory_space<smem>>
    %8 = vector.broadcast %7 : f32 to vector<16x128xf32>
    %9 = arith.mulf %6, %8 : vector<16x128xf32>
    %10 = arith.addf %4, %9 : vector<16x128xf32>
    %c2 = arith.constant 2 : index
    %c0_6 = arith.constant 0 : index
    %c0_7 = arith.constant 0 : index
    %11 = vector.load %arg1[%c2, %c0_6, %c0_7] : memref<3x16x128xf32, #tpu.memory_space<vmem>>, vector<1x16x128xf32>
    %12 = vector.shape_cast %11 : vector<1x16x128xf32> to vector<16x128xf32>
    %c2_8 = arith.constant 2 : index
    %13 = memref.load %arg2[%c2_8] : memref<3xf32, #tpu.memory_space<smem>>
    %14 = vector.broadcast %13 : f32 to vector<16x128xf32>
    %15 = arith.mulf %12, %14 : vector<16x128xf32>
    %16 = arith.addf %10, %15 : vector<16x128xf32>
    %c0_9 = arith.constant 0 : index
    %17 = memref.load %arg3[%c0_9] : memref<1xf32, #tpu.memory_space<smem>>
    %18 = vector.broadcast %17 : f32 to vector<16x128xf32>
    %19 = arith.addf %16, %18 : vector<16x128xf32>
    %c0_10 = arith.constant 0 : index
    %c0_11 = arith.constant 0 : index
    %20 = vector.load %arg4[%c0_10, %c0_11] : memref<16x128xf32, #tpu.memory_space<vmem>>, vector<16x128xf32>
    tpu.vector_store %arg4[%c0_10, %c0_11], %19 {strides = array<i32>} : memref<16x128xf32, #tpu.memory_space<vmem>>, vector<16x128xf32>,
    return
  }
  func.func @transform_0(%arg0: i32) -> (i32, i32, i32) {
    %c0_i32 = arith.constant 0 : i32
    %c0_i32_0 = arith.constant 0 : i32
    %c0_i32_1 = arith.constant 0 : i32
    return %c0_i32, %arg0, %c0_i32_0 : i32, i32, i32
  }
  func.func @transform_1(%arg0: i32) -> i32 {
    %c0_i32 = arith.constant 0 : i32
    %c0_i32_0 = arith.constant 0 : i32
    return %c0_i32 : i32
  }
  func.func @transform_2(%arg0: i32) -> i32 {
    %c0_i32 = arith.constant 0 : i32
    %c0_i32_0 = arith.constant 0 : i32
    return %c0_i32 : i32
  }
  func.func @transform_3(%arg0: i32) -> (i32, i32) {
    %c0_i32 = arith.constant 0 : i32
    %c0_i32_0 = arith.constant 0 : i32
    return %arg0, %c0_i32 : i32, i32
  }
}

</mosaic_0001>

<bundles_post_ra>
// kernel: multivariate_linear_regression.1
= control target key start
LH: loop header
LB: loop body
LE: loop exit
PB: predicated region body
PF: predicated region fallthrough
CT: control target
= control target key end

     0   :  { %s553_s0 = inlined_call_operand.vmem [shape: f32[3,48,128], index: 0, kind: input, shape index: {}]   ;;  %s554_s1 = inlined_call_operand.vmem [shape: f32[3], index: 1, kind: input, shape index: {}]   ;;  %s555_s2 = inlined_call_operand.<no memory space> [shape: f32[1], index: 2, kind: input, shape index: {}]   ;;  %s556_s3 = inlined_call_operand.vmem [shape: f32[48,128], index: 3, kind: output, shape index: {}]  }
   0x1   :  { %8 = sst [smem:[#allocation2]] %s555_s2 }
   0x2   :  { %9 = vsyncpa [#allocation5], 0  ;;  %s472_s14 = smov 0   ;;  %s474_s15 = smov 0  }
   0x3   :  { %s476_s16 = smov 0  }
   0x4 LB: > { %s348_s2 = sadd.s32 4294967295, %s446_s16   ;;  %s489_s17 = sadd.s32 1, %s446_s16   ;;  %s446_s16 = sphi %s476_s16, %s562_s16   ;;  %s442_s15 = sphi %s474_s15, %s561_s15   ;;  %s438_s14 = sphi %s472_s14, %s560_s14  }
   0x5   : > { %s19_s18 = ssub.s32 %s446_s16, %s489_s17  ;;  %s22_s19 = sadd.s32 1, %s442_s15 }
   0x6   : > { %p20_p0 = scmp.eq.s32.totalorder %s19_s18, 0  ;;  %p29_p1 = scmp.ne.s32.totalorder %s442_s15, %s438_s14 }
   0x7   : > { %p30_p2 = scmp.eq.s32.totalorder %s446_s16, 0  ;;  %p350_p3 = scmp.ge.s32.totalorder %s446_s16, 1 }
   0x8   : > { %s499_s20 = scalar_select %p20_p0, %s442_s15, %s22_s19  }
   0x9   : > { %p501_p4 = por %p30_p2, %p29_p1  ;;  %p114_p5 = scmp.lt.s32.totalorder %s446_s16, 4 }
   0xa   : > { %p508_p6 = scmp.eq.s32.totalorder %s348_s2, 0  ;;  %s127_s26 = sshll.u32 %s554_s1, 4  ;;  %s128_s26 = int_to_ptr.vmem [resolvable:$true] %s127_s26 }
   0xb   : > { %p512_p7 = pnand %p350_p3, %p114_p5  ;;  %s405_s27 = scalar_lea.vmem %s128_s26, 16 }
   0xc   : > { %p406_p10 = scmp.ne.s32.totalorder %s128_s26, %s405_s27  ;;  %p413_p0 = scmp.lt.s32.totalorder %s128_s26, %s128_s26 }
   0xd   : > { %p374_p8 = pneg %p512_p7  ;;  %p414_p1 = scmp.lt.s32.totalorder %s405_s27, %s405_s27 }
   0xf   : > { %p375_p9 = pnand %p508_p6, %p374_p8  ;;  %p415_p2 = por %p414_p1, %p413_p0 }
  0x11   : > { %p407_p11 = pneg %p375_p9 }
  0x13   : > { %p408_p12 = pnand %p407_p11, %p406_p10 }
  0x15   : > { %p409_p13 = pneg %p408_p12 }
  0x17   : > { %p416_p3 = pnand %p415_p2, %p409_p13 }
  0x19   : > { %419 = shalt.err (!%p416_p3)
}
  0x1a   : > { %s448_s28 = smov [#allocation4]   ;;  %p352_p5 = scmp.ge.s32.totalorder %s446_s16, 3 }
  0x1b   : > { %377 = dma.vmem_to_smem (!%p375_p9), %s128_s26, 16, %s448_s28, [#allocation5]  }
  0x1c   : > { %137 = sbr.rel (%p352_p5) target bundleno = 41 (0x29), region = 24 }
  0x21   : > { %140 = sbr.rel (!%p501_p4) target bundleno = 41 (0x29), region = 28  ;;  %s142_s29 = sand.u32 (%p501_p4), 1, %s442_s15  }
  0x22   : > { %s367_s30 = sshll.u32 (%p501_p4), %s446_s16, 4  ;;  %s368_s4 = smul.u32 (%p501_p4), 48, %s142_s29 }
  0x23   : > { %s147_s7 = scalar_lea.vmem (%p501_p4), %s553_s0, %s367_s30 }
  0x24   : > { %v186_v0 = vld [vmem:[%s147_s7] sm:$0xff] (%p501_p4)  ;;  %v188_v1 = vld [vmem:[%s147_s7 + $0x8] sm:$0xff] (%p501_p4)  ;;  %v190_v2 = vld [vmem:[%s147_s7 + $0x30] sm:$0xff] (%p501_p4)  ;;  %s144_s8 = scalar_lea.vmem (%p501_p4), [#allocation3], %s368_s4 }
  0x25   : > { %v192_v3 = vld [vmem:[%s147_s7 + $0x38] sm:$0xff] (%p501_p4)  ;;  %v194_v4 = vld [vmem:[%s147_s7 + $0x60] sm:$0xff] (%p501_p4)  ;;  %v196_v5 = vld [vmem:[%s147_s7 + $0x68] sm:$0xff] (%p501_p4)  ;;  %187 = vst [vmem:[%s144_s8] sm:$0xff] (%p501_p4), %v186_v0 }
  0x26   : > { %189 = vst [vmem:[%s144_s8 + $0x8] sm:$0xff] %v188_v1  ;;  %191 = vst [vmem:[%s144_s8 + $0x10] sm:$0xff] %v190_v2 }
  0x27   : > { %193 = vst [vmem:[%s144_s8 + $0x18] sm:$0xff] %v192_v3  ;;  %195 = vst [vmem:[%s144_s8 + $0x20] sm:$0xff] %v194_v4 }
  0x28   : > { %197 = vst [vmem:[%s144_s8 + $0x28] sm:$0xff] %v196_v5 }
  0x29 PF: > { %206 = sbr.rel (%p512_p7) target bundleno = 66 (0x42), region = 66  ;;  %s209_s9 = sand.u32 (!%p512_p7), 1, %s438_s14  }
  0x2a   : > { %s369_s10 = smul.u32 (!%p512_p7), 48, %s209_s9 }
  0x2c   : > { %s211_s11 = scalar_lea.vmem (!%p512_p7), [#allocation3], %s369_s10 }
  0x2e   : > { %433 = dma.done.wait (%p508_p6), [#allocation5], 16  }
  0x2f   : > { %435 = vsyncadd (%p508_p6), [#allocation5], 4294967280 }
  0x30   : > { %219 = sfence }
  0x31   : > { %s357_s12 = sshll.u32 %s348_s2, 1  ;;  %s246_s13 = sld [smem:[#allocation4]]  ;;  %v244_v6 = vld [vmem:[%s211_s11] sm:$0xff]  ;;  %v245_v7 = vld [vmem:[%s211_s11 + $0x8] sm:$0xff]  ;;  %v359_v8 = vld [vmem:[%s211_s11 + $0x10] sm:$0xff] }
  0x32   : > { %s361_s18 = sld [smem:[#allocation4 + $0x1]]  ;;  %p239_p4 = scmp.lt.s32.totalorder %s357_s12, 5  ;;  %v360_v9 = vld [vmem:[%s211_s11 + $0x18] sm:$0xff]  ;;  %v362_v11 = vld [vmem:[%s211_s11 + $0x20] sm:$0xff]  ;;  %v363_v12 = vld [vmem:[%s211_s11 + $0x28] sm:$0xff] }
  0x33   : > { %s364_s19 = sld [smem:[#allocation4 + $0x2]] }
  0x34   : > { %s268_s21 = sld [smem:[#allocation2]]  ;;  %s564_s12 = smov (!%p239_p4, %s357_s12), 5 }
  0x35   : > { %s358_s14 = sshll.u32 %s564_s12, 3 }
  0x36   : > { %s242_s22 = scalar_lea.vmem %s556_s3, %s358_s14 }
  0x37   : > { %v247_v10 = vstv %s246_s13 }
  0x38   : > { %v248_v13 = vmul.f32 %v247_v10, %v244_v6  ;;  %v249_v14 = vmul.f32 %v247_v10, %v245_v7  ;;  %v254_v15 = vstv %s361_s18 }
  0x39   : > { %v255_v16 = vmul.f32 %v359_v8, %v254_v15  ;;  %v256_v17 = vmul.f32 %v360_v9, %v254_v15  ;;  %v263_v18 = vstv %s364_s19 }
  0x3a   : > { %v264_v19 = vmul.f32 %v362_v11, %v263_v18  ;;  %v265_v20 = vmul.f32 %v363_v12, %v263_v18  ;;  %v269_v23 = vstv %s268_s21 }
  0x3b   : > { %v257_v21 = vadd.f32 %v255_v16, %v248_v13  ;;  %v258_v22 = vadd.f32 %v256_v17, %v249_v14 }
  0x3d   : > { %v266_v24 = vadd.f32 %v264_v19, %v257_v21  ;;  %v267_v25 = vadd.f32 %v265_v20, %v258_v22 }
  0x3f   : > { %v270_v26 = vadd.f32 %v269_v23, %v266_v24  ;;  %v271_v27 = vadd.f32 %v269_v23, %v267_v25 }
  0x41   : > { %272 = vst [vmem:[%s242_s22] sm:$0xff] %v270_v26  ;;  %273 = vst [vmem:[%s242_s22 + $0x8] sm:$0xff] %v271_v27 }
  0x42 PF: > { %p12_p6 = scmp.ge.s32.totalorder %s489_s17, 5   ;;  %s560_s14 = smov %s442_s15 }
  0x43   : > { %s561_s15 = smov %s499_s20  ;;  %s562_s16 = smov %s489_s17 }
  0x44   :  { %14 = sbr.rel (!%p12_p6) target bundleno = 4 (0x4), region = 112 }
  0x49   :  { %296 = vsyncpa [#allocation5], 1 }
  0x4a   :  { %298 = vsyncpa [#allocation5 + $0x1], 1 }

</bundles_post_ra>
